<compile_context>
chip_gen: v7x
topology: tpu7x:2x2x1
jax: 0.10.0
libtpu: 0.0.40
codegen_flags: <defaults>
</compile_context>

<pallas_src>
import jax
import jax.numpy as jnp
from jax import lax
from jax.experimental import pallas as pl
from jax.experimental.pallas import tpu as pltpu


def _temporal_attention_kernel(z_ref, m_ref, o_ref):
    # z_ref: (Bt, T, D) slab; m_ref: (D, D) = W^T W (symmetric); o_ref: (Bt, D)
    z = z_ref[...]                                   # native dtype (f32 / bf16)
    m = m_ref[...]

    # v[b] = M z[b, T-1]  -- one small MXU matmul per grid step.
    z_last = z[:, -1, :]                                                 # (Bt, D)
    v = lax.dot_general(z_last, m, (((1,), (0,)), ((), ())),
                        preferred_element_type=jnp.float32)              # (Bt, D) f32

    # Scores: lam[b,t] = <z[b,t,:], v[b,:]>  (VPU multiply + lane reduce, f32).
    lam = jnp.sum(z * v[:, None, :], axis=-1, keepdims=True)             # (Bt, T, 1) f32

    # Softmax over time (f32), normalization folded into the epilogue:
    #   out = (sum_t e_t * z_t) * 1 / (sum_t e_t)
    lam = lam - jnp.max(lam, axis=1, keepdims=True)
    e = jnp.exp(lam)                                                     # (Bt, T, 1) f32
    s = jnp.sum(e, axis=1)                                               # (Bt, 1)   f32
    acc = jnp.sum(e * z, axis=1)                                         # (Bt, D)   f32
    o_ref[...] = (acc * pl.reciprocal(s, approx=True)).astype(o_ref.dtype)


def _vmem_capacity_bytes() -> int:
    """Physical VMEM of the local TPU generation, conservative fallback."""
    try:
        cap = int(pltpu.get_tpu_info().vmem_capacity_bytes)
        if cap > 0:
            return cap
    except Exception:
        pass
    return 64 << 20  # v7x-sized fallback (smallest current generation)


def temporal_attention(z, w, *, block_b=None):
    """z: (B, T, D); w: (D, D) Conv1d(k=1, bias=False) weight (kernel dim squeezed).

    Returns (B, D): softmax_t(<W z_t, W z_{T-1}>)-weighted sum of z over time.
    """
    B, T, D = z.shape
    assert w.shape == (D, D)

    # Fold the projection: lam = z_t^T (W^T W) z_last. Computed once, in f32.
    wf = w.astype(jnp.float32)
    m = (wf.T @ wf).astype(z.dtype)

    zbytes = jnp.dtype(z.dtype).itemsize
    mbytes = jnp.dtype(m.dtype).itemsize

    # --- generation-aware VMEM plan ------------------------------------------
    vmem_cap = _vmem_capacity_bytes()                       # 64 MiB v7x / 128 MiB v5e,v6e
    hard_cap = max(32 << 20, min(vmem_cap - (12 << 20), 100 << 20))

    row_bytes = T * D * zbytes                              # one batch row of z
    # Per batch-row footprint: double-buffered z slab, ~3 slab-sized f32
    # temporaries inside the kernel (z*v, e*z, f32 promotion), double-buffered out.
    per_row = 2 * row_bytes + 3 * T * D * 4 + 2 * D * zbytes
    fixed = 2 * D * D * mbytes                              # weight (counted conservatively)
    budget = hard_cap - fixed - (4 << 20)
    max_bt = max(8, ((budget // per_row) // 8) * 8) if budget > per_row else 8

    # --- batch tile: byte-budget heuristic (~4 MiB z slab per grid step) -----
    if block_b is None:
        target_slab = 4 << 20
        bt = max(8, ((target_slab // max(row_bytes, 1)) // 8) * 8)
        bt = min(bt, max_bt)
        if bt >= B:
            if B >= 16:
                # Keep >= 2 grid steps so v7x's two TensorCores both get work.
                bt = (((B + 1) // 2 + 7) // 8) * 8
            else:
                bt = B
        else:
            bt = max(8, (bt // 8) * 8)
    else:
        bt = min(int(block_b), B, max_bt)
        if bt < B:
            bt = max(8, (bt // 8) * 8)

    Bt = max(1, bt)
    Bpad = pl.cdiv(B, Bt) * Bt
    zp = z if Bpad == B else jnp.pad(z, ((0, Bpad - B), (0, 0), (0, 0)))

    est_need = fixed + Bt * per_row
    vmem_limit = int(min(max(est_need + (4 << 20), 32 << 20), hard_cap))

    # Advisory cost: HBM stream of z + one small matmul per grid step.
    cost = pl.CostEstimate(
        flops=int(2 * Bpad * D * D + 4 * Bpad * T * D),
        transcendentals=int(Bpad * T + Bpad),
        bytes_accessed=int(Bpad * T * D * zbytes + D * D * mbytes + Bpad * D * zbytes),
    )

    def _call(single_buffer_weight):
        w_kwargs = dict(pipeline_mode=pl.Buffered(1)) if single_buffer_weight else {}
        return pl.pallas_call(
            _temporal_attention_kernel,
            out_shape=jax.ShapeDtypeStruct((Bpad, D), z.dtype),
            grid_spec=pltpu.PrefetchScalarGridSpec(
                num_scalar_prefetch=0,
                grid=(Bpad // Bt,),
                in_specs=[
                    pl.BlockSpec((Bt, T, D), lambda b: (b, 0, 0)),        # z slab
                    pl.BlockSpec((D, D), lambda b: (0, 0), **w_kwargs),   # M = W^T W
                ],
                out_specs=pl.BlockSpec((Bt, D), lambda b: (b, 0)),        # lane-dense out
            ),
            compiler_params=pltpu.CompilerParams(
                dimension_semantics=("parallel",),                        # independent batches
                vmem_limit_bytes=vmem_limit,
            ),
            cost_estimate=cost,
        )(zp, m)

    try:
        out = _call(True)    # constant weight block -> single-buffer its VMEM copy
    except Exception:        # pipeline_mode unsupported on this jax version -> default
        out = _call(False)

    return out[:B] if Bpad != B else out


def temporal_attention_ref(z, w):
    """Pure-JAX reference mirroring the PyTorch forward exactly."""
    h = jnp.einsum("btd,od->bto", z, w)            # conv1d k=1, no bias
    q = h[:, -1, :]                                # (B, D)
    lam = jnp.einsum("btd,bd->bt", h, q)           # (B, T)
    p = jax.nn.softmax(lam, axis=1)                # (B, T)
    return jnp.einsum("bt,btd->bd", p, z)          # (B, D)


if __name__ == "__main__":
    key = jax.random.PRNGKey(0)
    kz1, kw1, kz2, kw2, kz3, kw3 = jax.random.split(key, 6)

    # Case 1: the module's natural small shape (batch=2, seq=8, d_model=32).
    B, T, D = 2, 8, 32
    z = jax.random.normal(kz1, (B, T, D), dtype=jnp.float32)
    # Stand-in for nn.Conv1d(D, D, 1, bias=False).weight ((D, D, 1) -> (D, D)).
    w = jax.random.normal(kw1, (D, D), dtype=jnp.float32) * (1.0 / jnp.sqrt(D))
    out = jax.block_until_ready(temporal_attention(z, w))
    ref = temporal_attention_ref(z, w)
    assert out.shape == (B, D)
    assert jnp.allclose(out, ref, atol=5e-3, rtol=5e-3), "mismatch vs reference (case 1)"

    # Case 2: explicit batch tile smaller than B (padding path, multi-step grid).
    B2, T2, D2 = 12, 8, 128
    z2 = jax.random.normal(kz2, (B2, T2, D2), dtype=jnp.float32)
    w2 = jax.random.normal(kw2, (D2, D2), dtype=jnp.float32) * (1.0 / jnp.sqrt(D2))
    out2 = jax.block_until_ready(temporal_attention(z2, w2, block_b=8))
    ref2 = temporal_attention_ref(z2, w2)
    assert out2.shape == (B2, D2)
    assert jnp.allclose(out2, ref2, atol=5e-3, rtol=5e-3), "mismatch vs reference (case 2)"

    # Case 3: automatic tile selection with B large enough to force >= 2 grid
    # steps (exercises the byte-budget heuristic and the megacore split).
    B3, T3, D3 = 32, 8, 128
    z3 = jax.random.normal(kz3, (B3, T3, D3), dtype=jnp.float32)
    w3 = jax.random.normal(kw3, (D3, D3), dtype=jnp.float32) * (1.0 / jnp.sqrt(D3))
    out3 = jax.block_until_ready(temporal_attention(z3, w3))
    ref3 = temporal_attention_ref(z3, w3)
    assert out3.shape == (B3, D3)
    assert jnp.allclose(out3, ref3, atol=5e-3, rtol=5e-3), "mismatch vs reference (case 3)"

    print("KERNEL_OK")
</pallas_src>

<mosaic_0001>
module attributes {stable_mosaic.version = 11 : i64} {
  func.func @_temporal_attention_kernel(%arg0: i32, %arg1: memref<2x8x32xf32, #tpu.memory_space<vmem>>, %arg2: memref<32x32xf32, #tpu.memory_space<vmem>>, %arg3: memref<2x32xf32, #tpu.memory_space<vmem>>) attributes {dimension_semantics = [#tpu.dimension_semantics<parallel>], iteration_bounds = array<i64: 1>, scalar_prefetch = 0 : i64, scratch_operands = 0 : i64, tpu.core_type = #tpu.core_type<tc>, window_params = [{transform_indices = @transform_0, window_bounds = array<i64: 2, 8, 32>}, {pipeline_mode = #tpu.pipeline_mode<synchronous>, transform_indices = @transform_1, window_bounds = array<i64: 32, 32>}, {transform_indices = @transform_2, window_bounds = array<i64: 2, 32>}]} {
    %c0 = arith.constant 0 : index
    %c0_0 = arith.constant 0 : index
    %c0_1 = arith.constant 0 : index
    %0 = vector.load %arg1[%c0, %c0_0, %c0_1] : memref<2x8x32xf32, #tpu.memory_space<vmem>>, vector<2x8x32xf32>
    %c0_2 = arith.constant 0 : index
    %c0_3 = arith.constant 0 : index
    %1 = vector.load %arg2[%c0_2, %c0_3] : memref<32x32xf32, #tpu.memory_space<vmem>>, vector<32x32xf32>
    %2 = vector.extract_strided_slice %0 {offsets = [0, 7, 0], sizes = [2, 1, 32], strides = [1, 1, 1]} : vector<2x8x32xf32> to vector<2x1x32xf32>
    %3 = vector.shape_cast %2 : vector<2x1x32xf32> to vector<2x32xf32>
    %cst = arith.constant dense<0.000000e+00> : vector<2x32xf32>
    %4 = tpu.matmul %3, %1, %cst {dimension_numbers = #tpu.dot_dimension_numbers<[1], [0], [0], [1], [0, 0, 1, 1], [], []>} : vector<2x32xf32>, vector<32x32xf32>, vector<2x32xf32> -> vector<2x32xf32>
    %5 = vector.shape_cast %4 : vector<2x32xf32> to vector<2x1x32xf32>
    %6 = vector.broadcast %5 : vector<2x1x32xf32> to vector<2x8x32xf32>
    %7 = arith.mulf %0, %6 : vector<2x8x32xf32>
    %cst_4 = arith.constant dense<0.000000e+00> : vector<2x8xf32>
    %8 = vector.multi_reduction <add>, %7, %cst_4 [2] : vector<2x8x32xf32> to vector<2x8xf32>
    %9 = vector.shape_cast %8 : vector<2x8xf32> to vector<2x8x1xf32>
    %cst_5 = arith.constant dense<0xFF800000> : vector<2x1xf32>
    %10 = vector.multi_reduction <maximumf>, %9, %cst_5 [1] : vector<2x8x1xf32> to vector<2x1xf32>
    %11 = vector.shape_cast %10 : vector<2x1xf32> to vector<2x1x1xf32>
    %12 = vector.broadcast %11 : vector<2x1x1xf32> to vector<2x8x1xf32>
    %13 = arith.subf %9, %12 : vector<2x8x1xf32>
    %14 = math.exp %13 : vector<2x8x1xf32>
    %cst_6 = arith.constant dense<0.000000e+00> : vector<2x1xf32>
    %15 = vector.multi_reduction <add>, %14, %cst_6 [1] : vector<2x8x1xf32> to vector<2x1xf32>
    %16 = vector.broadcast %14 : vector<2x8x1xf32> to vector<2x8x32xf32>
    %17 = arith.mulf %16, %0 : vector<2x8x32xf32>
    %cst_7 = arith.constant dense<0.000000e+00> : vector<2x32xf32>
    %18 = vector.multi_reduction <add>, %17, %cst_7 [1] : vector<2x8x32xf32> to vector<2x32xf32>
    %19 = tpu.reciprocal %15 {approx = true} : vector<2x1xf32> -> vector<2x1xf32>
    %20 = vector.broadcast %19 : vector<2x1xf32> to vector<2x32xf32>
    %21 = arith.mulf %18, %20 : vector<2x32xf32>
    %c0_8 = arith.constant 0 : index
    %c0_9 = arith.constant 0 : index
    %22 = vector.load %arg3[%c0_8, %c0_9] : memref<2x32xf32, #tpu.memory_space<vmem>>, vector<2x32xf32>
    tpu.vector_store %arg3[%c0_8, %c0_9], %21 {strides = array<i32>} : memref<2x32xf32, #tpu.memory_space<vmem>>, vector<2x32xf32>,
    return
  }
  func.func @transform_0(%arg0: i32) -> (i32, i32, i32) {
    %c0_i32 = arith.constant 0 : i32
    %c0_i32_0 = arith.constant 0 : i32
    %c0_i32_1 = arith.constant 0 : i32
    return %arg0, %c0_i32, %c0_i32_0 : i32, i32, i32
  }
  func.func @transform_1(%arg0: i32) -> (i32, i32) {
    %c0_i32 = arith.constant 0 : i32
    %c0_i32_0 = arith.constant 0 : i32
    %c0_i32_1 = arith.constant 0 : i32
    return %c0_i32, %c0_i32_0 : i32, i32
  }
  func.func @transform_2(%arg0: i32) -> (i32, i32) {
    %c0_i32 = arith.constant 0 : i32
    %c0_i32_0 = arith.constant 0 : i32
    return %arg0, %c0_i32 : i32, i32
  }
}

module attributes {stable_mosaic.version = 11 : i64} {
  func.func @_temporal_attention_kernel(%arg0: i32, %arg1: memref<2x8x32xf32, #tpu.memory_space<vmem>>, %arg2: memref<32x32xf32, #tpu.memory_space<vmem>>, %arg3: memref<2x32xf32, #tpu.memory_space<vmem>>) attributes {dimension_semantics = [#tpu.dimension_semantics<parallel>], iteration_bounds = array<i64: 1>, scalar_prefetch = 0 : i64, scratch_operands = 0 : i64, tpu.core_type = #tpu.core_type<tc>, window_params = [{transform_indices = @transform_0, window_bounds = array<i64: 2, 8, 32>}, {pipeline_mode = #tpu.pipeline_mode<synchronous>, transform_indices = @transform_1, window_bounds = array<i64: 32, 32>}, {transform_indices = @transform_2, window_bounds = array<i64: 2, 32>}]} {
    %c0 = arith.constant 0 : index
    %c0_0 = arith.constant 0 : index
    %c0_1 = arith.constant 0 : index
    %0 = vector.load %arg1[%c0, %c0_0, %c0_1] : memref<2x8x32xf32, #tpu.memory_space<vmem>>, vector<2x8x32xf32>
    %c0_2 = arith.constant 0 : index
    %c0_3 = arith.constant 0 : index
    %1 = vector.load %arg2[%c0_2, %c0_3] : memref<32x32xf32, #tpu.memory_space<vmem>>, vector<32x32xf32>
    %2 = vector.extract_strided_slice %0 {offsets = [0, 7, 0], sizes = [2, 1, 32], strides = [1, 1, 1]} : vector<2x8x32xf32> to vector<2x1x32xf32>
    %3 = vector.shape_cast %2 : vector<2x1x32xf32> to vector<2x32xf32>
    %cst = arith.constant dense<0.000000e+00> : vector<2x32xf32>
    %4 = tpu.matmul %3, %1, %cst {dimension_numbers = #tpu.dot_dimension_numbers<[1], [0], [0], [1], [0, 0, 1, 1], [], []>} : vector<2x32xf32>, vector<32x32xf32>, vector<2x32xf32> -> vector<2x32xf32>
    %5 = vector.shape_cast %4 : vector<2x32xf32> to vector<2x1x32xf32>
    %6 = vector.broadcast %5 : vector<2x1x32xf32> to vector<2x8x32xf32>
    %7 = arith.mulf %0, %6 : vector<2x8x32xf32>
    %cst_4 = arith.constant dense<0.000000e+00> : vector<2x8xf32>
    %8 = vector.multi_reduction <add>, %7, %cst_4 [2] : vector<2x8x32xf32> to vector<2x8xf32>
    %9 = vector.shape_cast %8 : vector<2x8xf32> to vector<2x8x1xf32>
    %cst_5 = arith.constant dense<0xFF800000> : vector<2x1xf32>
    %10 = vector.multi_reduction <maximumf>, %9, %cst_5 [1] : vector<2x8x1xf32> to vector<2x1xf32>
    %11 = vector.shape_cast %10 : vector<2x1xf32> to vector<2x1x1xf32>
    %12 = vector.broadcast %11 : vector<2x1x1xf32> to vector<2x8x1xf32>
    %13 = arith.subf %9, %12 : vector<2x8x1xf32>
    %14 = math.exp %13 : vector<2x8x1xf32>
    %cst_6 = arith.constant dense<0.000000e+00> : vector<2x1xf32>
    %15 = vector.multi_reduction <add>, %14, %cst_6 [1] : vector<2x8x1xf32> to vector<2x1xf32>
    %16 = vector.broadcast %14 : vector<2x8x1xf32> to vector<2x8x32xf32>
    %17 = arith.mulf %16, %0 : vector<2x8x32xf32>
    %cst_7 = arith.constant dense<0.000000e+00> : vector<2x32xf32>
    %18 = vector.multi_reduction <add>, %17, %cst_7 [1] : vector<2x8x32xf32> to vector<2x32xf32>
    %19 = tpu.reciprocal %15 {approx = true} : vector<2x1xf32> -> vector<2x1xf32>
    %20 = vector.broadcast %19 : vector<2x1xf32> to vector<2x32xf32>
    %21 = arith.mulf %18, %20 : vector<2x32xf32>
    %c0_8 = arith.constant 0 : index
    %c0_9 = arith.constant 0 : index
    %22 = vector.load %arg3[%c0_8, %c0_9] : memref<2x32xf32, #tpu.memory_space<vmem>>, vector<2x32xf32>
    tpu.vector_store %arg3[%c0_8, %c0_9], %21 {strides = array<i32>} : memref<2x32xf32, #tpu.memory_space<vmem>>, vector<2x32xf32>,
    return
  }
  func.func @transform_0(%arg0: i32) -> (i32, i32, i32) {
    %c0_i32 = arith.constant 0 : i32
    %c0_i32_0 = arith.constant 0 : i32
    %c0_i32_1 = arith.constant 0 : i32
    return %arg0, %c0_i32, %c0_i32_0 : i32, i32, i32
  }
  func.func @transform_1(%arg0: i32) -> (i32, i32) {
    %c0_i32 = arith.constant 0 : i32
    %c0_i32_0 = arith.constant 0 : i32
    %c0_i32_1 = arith.constant 0 : i32
    return %c0_i32, %c0_i32_0 : i32, i32
  }
  func.func @transform_2(%arg0: i32) -> (i32, i32) {
    %c0_i32 = arith.constant 0 : i32
    %c0_i32_0 = arith.constant 0 : i32
    return %arg0, %c0_i32 : i32, i32
  }
}

</mosaic_0001>

<bundles_post_ra>
// kernel: tpu_custom_call.1
= control target key start
LH: loop header
LB: loop body
LE: loop exit
PB: predicated region body
PF: predicated region fallthrough
CT: control target
= control target key end

     0   :  { %7 = vsyncpa [#allocation3], 0  ;;  %s417_s0 = inlined_call_operand.hbm [shape: f32[2,8,32], index: 0, kind: input, shape index: {}]   ;;  %s418_s1 = inlined_call_operand.hbm [shape: f32[32,32], index: 1, kind: input, shape index: {}]   ;;  %s419_s2 = inlined_call_operand.hbm [shape: f32[2,32], index: 2, kind: output, shape index: {}]  }
   0x1   :  { %8 = vsyncpa [#allocation6], 0 }
   0x2   :  { %9 = vsyncpa [#allocation4], 0  ;;  %s350_s9 = smov [#allocation2]   ;;  %s278_s13 = scalar_lea.hbm %s417_s0, 256 }
   0x3   :  { %s15_s10 = sshll.u32 %s350_s9, 4  ;;  %p279_p0 = scmp.ne.s32.totalorder %s417_s0, %s278_s13  ;;  %s16_s10 = int_to_ptr.vmem [resolvable:$true] %s15_s10 }
   0x4   :  { %p282_p1 = scmp.lt.u32.totalorder %s278_s13, %s417_s0 }
   0x6   :  { %p284_p2 = pnand %p282_p1, %p279_p0 }
   0x8   :  { %287 = shalt.err (!%p284_p2)
}
   0x9   :  { %s288_s18 = scalar_lea.vmem %s16_s10, 256  ;;  %p293_p4 = scmp.lt.s32.totalorder %s16_s10, %s16_s10 }
   0xa   :  { %p289_p3 = scmp.ne.s32.totalorder %s16_s10, %s288_s18  ;;  %p294_p5 = scmp.lt.s32.totalorder %s288_s18, %s288_s18 }
   0xc   :  { %p295_p6 = por %p294_p5, %p293_p4 }
   0xe   :  { %p296_p7 = pnand %p295_p6, %p289_p3 }
  0x10   :  { %299 = shalt.err (!%p296_p7)
}
  0x11   :  { %s351_s19 = smov 128   ;;  %s352_s20 = smov 8  }
  0x12   :  { %21 = dma.hbm_to_vmem [thread:$0]  %s417_s0, 256, %s16_s10, [#allocation3], %s351_s19, %s351_s19, %s352_s20  }
  0x13   :  { %s353_s23 = smov [#allocation5]   ;;  %s300_s27 = scalar_lea.hbm %s418_s1, 512 }
  0x14   :  { %s27_s24 = sshll.u32 %s353_s23, 4  ;;  %p301_p8 = scmp.ne.s32.totalorder %s418_s1, %s300_s27  ;;  %s28_s24 = int_to_ptr.vmem [resolvable:$true] %s27_s24 }
  0x15   :  { %p304_p9 = scmp.lt.u32.totalorder %s300_s27, %s418_s1 }
  0x17   :  { %p306_p10 = pnand %p304_p9, %p301_p8 }
  0x19   :  { %309 = shalt.err (!%p306_p10)
}
  0x1a   :  { %s310_s4 = scalar_lea.vmem %s28_s24, 512  ;;  %p315_p12 = scmp.lt.s32.totalorder %s28_s24, %s28_s24 }
  0x1b   :  { %p311_p11 = scmp.ne.s32.totalorder %s28_s24, %s310_s4  ;;  %p316_p13 = scmp.lt.s32.totalorder %s310_s4, %s310_s4 }
  0x1d   :  { %p317_p0 = por %p316_p13, %p315_p12 }
  0x1f   :  { %p318_p1 = pnand %p317_p0, %p311_p11 }
  0x21   :  { %321 = shalt.err (!%p318_p1)
}
  0x22   :  { %33 = dma.hbm_to_vmem [thread:$0]  %s418_s1, 512, %s28_s24, [#allocation6], %s351_s19, %s351_s19, %s352_s20  }
  0x23   :  { %344 = dma.done.wait [#allocation3], 256  }
  0x24   :  { %345 = vsyncadd [#allocation3], 4294967040 }
  0x25   :  { %346 = dma.done.wait [#allocation6], 512  }
  0x26   :  { %347 = vsyncadd [#allocation6], 4294966784  ;;  %v354_v0 = vmov 0.0|0.0   ;;  %vm355_vm0 = vmmov 0   ;;  %v356_v1 = vmov 0.0   ;;  %v42_v2 = vld [vmem:[#allocation5] sm:$0xff]  ;;  %v129_v15 = vlaneseq }
  0x27   :  { %255 = vmatprep.subr.bf16.mxu0 %v354_v0  ;;  %252 = vmatprep.mubr.msk.f32.mxu0 %vm355_vm0, %v356_v1  ;;  %v43_v3 = vld [vmem:[#allocation5 + $0x8] sm:$0xff]  ;;  %v44_v4 = vld [vmem:[#allocation5 + $0x10] sm:$0xff]  ;;  %v45_v6 = vld [vmem:[#allocation5 + $0x18] sm:$0xff]  ;;  %vm50_vm1 = vcmask 1041409   ;;  %vm52_vm2 = vcmask 261120   ;;  %s358_s1 = smov [#allocation7]  }
  0x28   :  { %v256_v5 = vpack.c.bf16 %v43_v3, %v42_v2  ;;  %v40_v7 = vld [vmem:[#allocation2] sm:$0xff]  ;;  %v41_v8 = vld [vmem:[#allocation2 + $0x8] sm:$0xff]  ;;  %v259_v9 = vpack.c.bf16 %v45_v6, %v44_v4  ;;  %v357_v13 = vmov 1966171168   ;;  %v130_v17 = vshrl.u32 %v129_v15, 7  ;;  %s228_s6 = sshll.u32 %s358_s1, 4  ;;  %s229_s6 = int_to_ptr.vmem [resolvable:$true] %s228_s6 }
  0x29   :  { %v48_v10 = vrot.slane %v40_v7, 7  ;;  %v49_v11 = vrot.slane %v41_v8, 6  ;;  %v127_v14 = vunpack.c.l.s4 %v357_v13  ;;  %vm220_vm3 = vcmask 254976   ;;  %s322_s7 = scalar_lea.vmem %s229_s6, 32  ;;  %p327_p3 = scmp.lt.s32.totalorder %s229_s6, %s229_s6 }
  0x2a   :  { %257 = vmatpush3.bf16.msra.mxu0 %v256_v5  ;;  %v150_v22 = vsub.s32 0, %v130_v17  ;;  %p323_p2 = scmp.ne.s32.totalorder %s229_s6, %s322_s7  ;;  %p328_p4 = scmp.lt.s32.totalorder %s322_s7, %s322_s7 }
  0x2b   :  { %258 = vmatprep.subr.bf16.mxu0 %v354_v0  ;;  %v51_v12 = vsel %vm50_vm1, %v49_v11, %v48_v10  ;;  %v128_v16 = vunpack.c.0.s8 %v127_v14 }
  0x2c   :  { %p329_p5 = por %p328_p4, %p327_p3 }
  0x2d   :  { %v131_v18 = vsub.s32 %v128_v16, %v130_v17 }
  0x2e   :  { %260 = vmatpush3.bf16.msra.mxu0 %v259_v9  ;;  %p330_p6 = pnand %p329_p5, %p323_p2 }
  0x31   :  { %253 = vmatmul.mubr.msk.f32.vlgmr.msra.gmra.mrb[0].mxu0 %vm52_vm2, %v51_v12 }
 0x104   :  { %v121_v19 = vpop.f32.mrb[0].mxu0 }
 0x105   :  { %v132_v20 = vrot.slane %v121_v19, %v131_v18  ;;  %v254_v21 = vpop.f32.mrb[1].mxu0 }
 0x107   :  { %v133_v23 = vcombine.high %v132_v20, %v132_v20  ;;  %v140_v24 = vrot.slane %v132_v20, %v131_v18 }
 0x109   :  { %v147_v25 = vrot.slane %v133_v23, %v131_v18  ;;  %v151_v26 = vrot.slane %v140_v24, %v150_v22 }
 0x10b   :  { %v158_v27 = vmul.f32 %v151_v26, %v40_v7  ;;  %v155_v28 = vrot.slane %v147_v25, %v150_v22 }
 0x10d   :  { %v160_v29 = vsel %vm52_vm2, %v158_v27, 0.0  ;;  %v159_v30 = vmul.f32 %v155_v28, %v41_v8 }
 0x10e   :  { %161 = vadd.xlane.f32.xlu0 %v160_v29 }
 0x10f   :  { %v163_v31 = vsel %vm52_vm2, %v159_v30, 0.0 }
 0x112   :  { %164 = vadd.xlane.f32.xlu0 %v163_v31 }
 0x19b   :  { %v162_v32 = vpop.xlane.xlu0 %161 }
 0x19c   :  { %v166_v33 = vrot.slane %v162_v32, 4 }
 0x19e   :  { %v167_v34 = vmax.f32 %v162_v32, %v166_v33 }
 0x19f   :  { %v165_v35 = vpop.xlane.xlu0 %164 }
 0x1a0   :  { %v168_v36 = vrot.slane %v167_v34, 2  ;;  %v172_v37 = vrot.slane %v165_v35, 4 }
 0x1a2   :  { %v169_v38 = vmax.f32 %v167_v34, %v168_v36  ;;  %v173_v39 = vmax.f32 %v165_v35, %v172_v37 }
 0x1a4   :  { %v170_v40 = vrot.slane %v169_v38, 1  ;;  %v174_v41 = vrot.slane %v173_v39, 2 }
 0x1a6   :  { %v171_v42 = vmax.f32 %v169_v38, %v170_v40  ;;  %v175_v43 = vmax.f32 %v173_v39, %v174_v41 }
 0x1a8   :  { %v178_v44 = vsub.f32 %v162_v32, %v171_v42  ;;  %v176_v45 = vrot.slane %v175_v43, 1 }
 0x1aa   :  { %v180_v46 = vmul.f32 1.442695, %v178_v44  ;;  %v177_v47 = vmax.f32 %v175_v43, %v176_v45 }
 0x1ac   :  { %270 = vpow2.f32 %v180_v46  ;;  %v179_v48 = vsub.f32 %v165_v35, %v177_v47 }
 0x1ae   :  { %v182_v49 = vmul.f32 1.442695, %v179_v48 }
 0x1b0   :  { %272 = vpow2.f32 %v182_v49 }
 0x1b6   :  { %v271_v50 = vpop.eup %270 }
 0x1b7   :  { %v184_v51 = vrot.slane %v271_v50, 4  ;;  %v196_v52 = vmul.f32 %v271_v50, %v40_v7 }
 0x1b9   :  { %v185_v53 = vadd.f32 %v271_v50, %v184_v51  ;;  %v198_v54 = vsel %vm52_vm2, %v196_v52, 0.0 }
 0x1ba   :  { %v273_v55 = vpop.eup %272  ;;  %v199_v59 = vrot.slane %v198_v54, 4 }
 0x1bb   :  { %v186_v56 = vrot.slane %v185_v53, 2  ;;  %v190_v57 = vrot.slane %v273_v55, 4  ;;  %v197_v58 = vmul.f32 %v273_v55, %v41_v8 }
 0x1bc   :  { %v200_v2 = vadd.f32 %v199_v59, %v198_v54 }
 0x1bd   :  { %v187_v60 = vadd.f32 %v186_v56, %v185_v53  ;;  %v191_v61 = vadd.f32 %v273_v55, %v190_v57  ;;  %v205_v62 = vsel %vm52_vm2, %v197_v58, 0.0 }
 0x1be   :  { %v206_v63 = vrot.slane %v205_v62, 4  ;;  %v201_v7 = vrot.slane %v200_v2, 2 }
 0x1bf   :  { %v188_v0 = vrot.slane %v187_v60, 1  ;;  %v192_v1 = vrot.slane %v191_v61, 2 }
 0x1c0   :  { %v207_v3 = vadd.f32 %v206_v63, %v205_v62  ;;  %v202_v11 = vadd.f32 %v201_v7, %v200_v2 }
 0x1c1   :  { %v189_v4 = vadd.f32 %v188_v0, %v187_v60  ;;  %v193_v5 = vadd.f32 %v192_v1, %v191_v61 }
 0x1c2   :  { %v208_v9 = vrot.slane %v207_v3, 2  ;;  %v203_v12 = vrot.slane %v202_v11, 1 }
 0x1c3   :  { %v194_v6 = vrot.slane %v193_v5, 1  ;;  %274 = vrcp.f32 %v189_v4 }
 0x1c4   :  { %v209_v8 = vadd.f32 %v208_v9, %v207_v3  ;;  %v204_v15 = vadd.f32 %v203_v12, %v202_v11 }
 0x1c5   :  { %v195_v10 = vadd.f32 %v194_v6, %v193_v5 }
 0x1c6   :  { %v210_v13 = vrot.slane %v209_v8, 1 }
 0x1c7   :  { %276 = vrcp.f32 %v195_v10 }
 0x1c8   :  { %v211_v16 = vadd.f32 %v210_v13, %v209_v8 }
 0x1cd   :  { %v275_v14 = vpop.eup %274 }
 0x1ce   :  { %v214_v18 = vmul.f32 %v275_v14, %v204_v15 }
 0x1d1   :  { %v277_v17 = vpop.eup %276 }
 0x1d2   :  { %v215_v19 = vmul.f32 %v277_v17, %v211_v16 }
 0x1d4   :  { %v218_v20 = vsel %vm50_vm1, %v215_v19, %v214_v18 }
 0x1d5   :  { %221 = vst.msk [vmem:[#allocation7] sm:$0x3] %vm220_vm3, %v218_v20 }
 0x1d6   :  { %333 = shalt.err (!%p330_p6)
}
 0x1d7   :  { %s334_s10 = scalar_lea.hbm %s419_s2, 32 }
 0x1d8   :  { %p335_p7 = scmp.ne.s32.totalorder %s419_s2, %s334_s10  ;;  %p338_p8 = scmp.lt.u32.totalorder %s334_s10, %s419_s2 }
 0x1da   :  { %p340_p9 = pnand %p338_p8, %p335_p7 }
 0x1dc   :  { %343 = shalt.err (!%p340_p9)
}
 0x1dd   :  { %231 = dma.vmem_to_hbm [thread:$0]  %s229_s6, 32, %s419_s2, [#allocation4]  }
 0x1de   :  { %348 = dma.done.wait [#allocation4], 32  }
 0x1df   :  { %349 = vsyncadd [#allocation4], 4294967264 }
 0x1e0   :  { %235 = vsyncpa [#allocation3], 1 }
 0x1e1   :  { %236 = vsyncpa [#allocation6], 1 }
 0x1e2   :  { %237 = vsyncpa [#allocation4], 1 }

// kernel: tpu_custom_call.1
= control target key start
LH: loop header
LB: loop body
LE: loop exit
PB: predicated region body
PF: predicated region fallthrough
CT: control target
= control target key end

     0   :  { %7 = vsyncpa [#allocation3], 0  ;;  %s417_s0 = inlined_call_operand.hbm [shape: f32[2,8,32], index: 0, kind: input, shape index: {}]   ;;  %s418_s1 = inlined_call_operand.hbm [shape: f32[32,32], index: 1, kind: input, shape index: {}]   ;;  %s419_s2 = inlined_call_operand.hbm [shape: f32[2,32], index: 2, kind: output, shape index: {}]  }
   0x1   :  { %8 = vsyncpa [#allocation6], 0 }
   0x2   :  { %9 = vsyncpa [#allocation4], 0  ;;  %s350_s9 = smov [#allocation2]   ;;  %s278_s13 = scalar_lea.hbm %s417_s0, 256 }
   0x3   :  { %s15_s10 = sshll.u32 %s350_s9, 4  ;;  %p279_p0 = scmp.ne.s32.totalorder %s417_s0, %s278_s13  ;;  %s16_s10 = int_to_ptr.vmem [resolvable:$true] %s15_s10 }
   0x4   :  { %p282_p1 = scmp.lt.u32.totalorder %s278_s13, %s417_s0 }
   0x6   :  { %p284_p2 = pnand %p282_p1, %p279_p0 }
   0x8   :  { %287 = shalt.err (!%p284_p2)
}
   0x9   :  { %s288_s18 = scalar_lea.vmem %s16_s10, 256  ;;  %p293_p4 = scmp.lt.s32.totalorder %s16_s10, %s16_s10 }
   0xa   :  { %p289_p3 = scmp.ne.s32.totalorder %s16_s10, %s288_s18  ;;  %p294_p5 = scmp.lt.s32.totalorder %s288_s18, %s288_s18 }
   0xc   :  { %p295_p6 = por %p294_p5, %p293_p4 }
   0xe   :  { %p296_p7 = pnand %p295_p6, %p289_p3 }
  0x10   :  { %299 = shalt.err (!%p296_p7)
}
  0x11   :  { %s351_s19 = smov 128   ;;  %s352_s20 = smov 8  }
  0x12   :  { %21 = dma.hbm_to_vmem [thread:$0]  %s417_s0, 256, %s16_s10, [#allocation3], %s351_s19, %s351_s19, %s352_s20  }
  0x13   :  { %s353_s23 = smov [#allocation5]   ;;  %s300_s27 = scalar_lea.hbm %s418_s1, 512 }
  0x14   :  { %s27_s24 = sshll.u32 %s353_s23, 4  ;;  %p301_p8 = scmp.ne.s32.totalorder %s418_s1, %s300_s27  ;;  %s28_s24 = int_to_ptr.vmem [resolvable:$true] %s27_s24 }
  0x15   :  { %p304_p9 = scmp.lt.u32.totalorder %s300_s27, %s418_s1 }
  0x17   :  { %p306_p10 = pnand %p304_p9, %p301_p8 }
  0x19   :  { %309 = shalt.err (!%p306_p10)
}
  0x1a   :  { %s310_s4 = scalar_lea.vmem %s28_s24, 512  ;;  %p315_p12 = scmp.lt.s32.totalorder %s28_s24, %s28_s24 }
  0x1b   :  { %p311_p11 = scmp.ne.s32.totalorder %s28_s24, %s310_s4  ;;  %p316_p13 = scmp.lt.s32.totalorder %s310_s4, %s310_s4 }
  0x1d   :  { %p317_p0 = por %p316_p13, %p315_p12 }
  0x1f   :  { %p318_p1 = pnand %p317_p0, %p311_p11 }
  0x21   :  { %321 = shalt.err (!%p318_p1)
}
  0x22   :  { %33 = dma.hbm_to_vmem [thread:$0]  %s418_s1, 512, %s28_s24, [#allocation6], %s351_s19, %s351_s19, %s352_s20  }
  0x23   :  { %344 = dma.done.wait [#allocation3], 256  }
  0x24   :  { %345 = vsyncadd [#allocation3], 4294967040 }
  0x25   :  { %346 = dma.done.wait [#allocation6], 512  }
  0x26   :  { %347 = vsyncadd [#allocation6], 4294966784  ;;  %v354_v0 = vmov 0.0|0.0   ;;  %vm355_vm0 = vmmov 0   ;;  %v356_v1 = vmov 0.0   ;;  %v42_v2 = vld [vmem:[#allocation5] sm:$0xff]  ;;  %v129_v15 = vlaneseq }
  0x27   :  { %255 = vmatprep.subr.bf16.mxu0 %v354_v0  ;;  %252 = vmatprep.mubr.msk.f32.mxu0 %vm355_vm0, %v356_v1  ;;  %v43_v3 = vld [vmem:[#allocation5 + $0x8] sm:$0xff]  ;;  %v44_v4 = vld [vmem:[#allocation5 + $0x10] sm:$0xff]  ;;  %v45_v6 = vld [vmem:[#allocation5 + $0x18] sm:$0xff]  ;;  %vm50_vm1 = vcmask 1041409   ;;  %vm52_vm2 = vcmask 261120   ;;  %s358_s1 = smov [#allocation7]  }
  0x28   :  { %v256_v5 = vpack.c.bf16 %v43_v3, %v42_v2  ;;  %v40_v7 = vld [vmem:[#allocation2] sm:$0xff]  ;;  %v41_v8 = vld [vmem:[#allocation2 + $0x8] sm:$0xff]  ;;  %v259_v9 = vpack.c.bf16 %v45_v6, %v44_v4  ;;  %v357_v13 = vmov 1966171168   ;;  %v130_v17 = vshrl.u32 %v129_v15, 7  ;;  %s228_s6 = sshll.u32 %s358_s1, 4  ;;  %s229_s6 = int_to_ptr.vmem [resolvable:$true] %s228_s6 }
  0x29   :  { %v48_v10 = vrot.slane %v40_v7, 7  ;;  %v49_v11 = vrot.slane %v41_v8, 6  ;;  %v127_v14 = vunpack.c.l.s4 %v357_v13  ;;  %vm220_vm3 = vcmask 254976   ;;  %s322_s7 = scalar_lea.vmem %s229_s6, 32  ;;  %p327_p3 = scmp.lt.s32.totalorder %s229_s6, %s229_s6 }
  0x2a   :  { %257 = vmatpush3.bf16.msra.mxu0 %v256_v5  ;;  %v150_v22 = vsub.s32 0, %v130_v17  ;;  %p323_p2 = scmp.ne.s32.totalorder %s229_s6, %s322_s7  ;;  %p328_p4 = scmp.lt.s32.totalorder %s322_s7, %s322_s7 }
  0x2b   :  { %258 = vmatprep.subr.bf16.mxu0 %v354_v0  ;;  %v51_v12 = vsel %vm50_vm1, %v49_v11, %v48_v10  ;;  %v128_v16 = vunpack.c.0.s8 %v127_v14 }
  0x2c   :  { %p329_p5 = por %p328_p4, %p327_p3 }
  0x2d   :  { %v131_v18 = vsub.s32 %v128_v16, %v130_v17 }
  0x2e   :  { %260 = vmatpush3.bf16.msra.mxu0 %v259_v9  ;;  %p330_p6 = pnand %p329_p5, %p323_p2 }
  0x31   :  { %253 = vmatmul.mubr.msk.f32.vlgmr.msra.gmra.mrb[0].mxu0 %vm52_vm2, %v51_v12 }
 0x104   :  { %v121_v19 = vpop.f32.mrb[0].mxu0 }
 0x105   :  { %v132_v20 = vrot.slane %v121_v19, %v131_v18  ;;  %v254_v21 = vpop.f32.mrb[1].mxu0 }
 0x107   :  { %v133_v23 = vcombine.high %v132_v20, %v132_v20  ;;  %v140_v24 = vrot.slane %v132_v20, %v131_v18 }
 0x109   :  { %v147_v25 = vrot.slane %v133_v23, %v131_v18  ;;  %v151_v26 = vrot.slane %v140_v24, %v150_v22 }
 0x10b   :  { %v158_v27 = vmul.f32 %v151_v26, %v40_v7  ;;  %v155_v28 = vrot.slane %v147_v25, %v150_v22 }
 0x10d   :  { %v160_v29 = vsel %vm52_vm2, %v158_v27, 0.0  ;;  %v159_v30 = vmul.f32 %v155_v28, %v41_v8 }
 0x10e   :  { %161 = vadd.xlane.f32.xlu0 %v160_v29 }
 0x10f   :  { %v163_v31 = vsel %vm52_vm2, %v159_v30, 0.0 }
 0x112   :  { %164 = vadd.xlane.f32.xlu0 %v163_v31 }
 0x19b   :  { %v162_v32 = vpop.xlane.xlu0 %161 }
 0x19c   :  { %v166_v33 = vrot.slane %v162_v32, 4 }
 0x19e   :  { %v167_v34 = vmax.f32 %v162_v32, %v166_v33 }
 0x19f   :  { %v165_v35 = vpop.xlane.xlu0 %164 }
 0x1a0   :  { %v168_v36 = vrot.slane %v167_v34, 2  ;;  %v172_v37 = vrot.slane %v165_v35, 4 }
 0x1a2   :  { %v169_v38 = vmax.f32 %v167_v34, %v168_v36  ;;  %v173_v39 = vmax.f32 %v165_v35, %v172_v37 }
 0x1a4   :  { %v170_v40 = vrot.slane %v169_v38, 1  ;;  %v174_v41 = vrot.slane %v173_v39, 2 }
 0x1a6   :  { %v171_v42 = vmax.f32 %v169_v38, %v170_v40  ;;  %v175_v43 = vmax.f32 %v173_v39, %v174_v41 }
 0x1a8   :  { %v178_v44 = vsub.f32 %v162_v32, %v171_v42  ;;  %v176_v45 = vrot.slane %v175_v43, 1 }
 0x1aa   :  { %v180_v46 = vmul.f32 1.442695, %v178_v44  ;;  %v177_v47 = vmax.f32 %v175_v43, %v176_v45 }
 0x1ac   :  { %270 = vpow2.f32 %v180_v46  ;;  %v179_v48 = vsub.f32 %v165_v35, %v177_v47 }
 0x1ae   :  { %v182_v49 = vmul.f32 1.442695, %v179_v48 }
 0x1b0   :  { %272 = vpow2.f32 %v182_v49 }
 0x1b6   :  { %v271_v50 = vpop.eup %270 }
 0x1b7   :  { %v184_v51 = vrot.slane %v271_v50, 4  ;;  %v196_v52 = vmul.f32 %v271_v50, %v40_v7 }
 0x1b9   :  { %v185_v53 = vadd.f32 %v271_v50, %v184_v51  ;;  %v198_v54 = vsel %vm52_vm2, %v196_v52, 0.0 }
 0x1ba   :  { %v273_v55 = vpop.eup %272  ;;  %v199_v59 = vrot.slane %v198_v54, 4 }
 0x1bb   :  { %v186_v56 = vrot.slane %v185_v53, 2  ;;  %v190_v57 = vrot.slane %v273_v55, 4  ;;  %v197_v58 = vmul.f32 %v273_v55, %v41_v8 }
 0x1bc   :  { %v200_v2 = vadd.f32 %v199_v59, %v198_v54 }
 0x1bd   :  { %v187_v60 = vadd.f32 %v186_v56, %v185_v53  ;;  %v191_v61 = vadd.f32 %v273_v55, %v190_v57  ;;  %v205_v62 = vsel %vm52_vm2, %v197_v58, 0.0 }
 0x1be   :  { %v206_v63 = vrot.slane %v205_v62, 4  ;;  %v201_v7 = vrot.slane %v200_v2, 2 }
 0x1bf   :  { %v188_v0 = vrot.slane %v187_v60, 1  ;;  %v192_v1 = vrot.slane %v191_v61, 2 }
 0x1c0   :  { %v207_v3 = vadd.f32 %v206_v63, %v205_v62  ;;  %v202_v11 = vadd.f32 %v201_v7, %v200_v2 }
 0x1c1   :  { %v189_v4 = vadd.f32 %v188_v0, %v187_v60  ;;  %v193_v5 = vadd.f32 %v192_v1, %v191_v61 }
 0x1c2   :  { %v208_v9 = vrot.slane %v207_v3, 2  ;;  %v203_v12 = vrot.slane %v202_v11, 1 }
 0x1c3   :  { %v194_v6 = vrot.slane %v193_v5, 1  ;;  %274 = vrcp.f32 %v189_v4 }
 0x1c4   :  { %v209_v8 = vadd.f32 %v208_v9, %v207_v3  ;;  %v204_v15 = vadd.f32 %v203_v12, %v202_v11 }
 0x1c5   :  { %v195_v10 = vadd.f32 %v194_v6, %v193_v5 }
 0x1c6   :  { %v210_v13 = vrot.slane %v209_v8, 1 }
 0x1c7   :  { %276 = vrcp.f32 %v195_v10 }
 0x1c8   :  { %v211_v16 = vadd.f32 %v210_v13, %v209_v8 }
 0x1cd   :  { %v275_v14 = vpop.eup %274 }
 0x1ce   :  { %v214_v18 = vmul.f32 %v275_v14, %v204_v15 }
 0x1d1   :  { %v277_v17 = vpop.eup %276 }
 0x1d2   :  { %v215_v19 = vmul.f32 %v277_v17, %v211_v16 }
 0x1d4   :  { %v218_v20 = vsel %vm50_vm1, %v215_v19, %v214_v18 }
 0x1d5   :  { %221 = vst.msk [vmem:[#allocation7] sm:$0x3] %vm220_vm3, %v218_v20 }
 0x1d6   :  { %333 = shalt.err (!%p330_p6)
}
 0x1d7   :  { %s334_s10 = scalar_lea.hbm %s419_s2, 32 }
 0x1d8   :  { %p335_p7 = scmp.ne.s32.totalorder %s419_s2, %s334_s10  ;;  %p338_p8 = scmp.lt.u32.totalorder %s334_s10, %s419_s2 }
 0x1da   :  { %p340_p9 = pnand %p338_p8, %p335_p7 }
 0x1dc   :  { %343 = shalt.err (!%p340_p9)
}
 0x1dd   :  { %231 = dma.vmem_to_hbm [thread:$0]  %s229_s6, 32, %s419_s2, [#allocation4]  }
 0x1de   :  { %348 = dma.done.wait [#allocation4], 32  }
 0x1df   :  { %349 = vsyncadd [#allocation4], 4294967264 }
 0x1e0   :  { %235 = vsyncpa [#allocation3], 1 }
 0x1e1   :  { %236 = vsyncpa [#allocation6], 1 }
 0x1e2   :  { %237 = vsyncpa [#allocation4], 1 }

</bundles_post_ra>
